<compile_context>
chip_gen: v5e
topology: v5e:2x2
jax: 0.10.0
libtpu: 0.0.40
codegen_flags: <defaults>
</compile_context>

<pallas_src>
import functools

import jax
import jax.numpy as jnp
from jax.experimental import pallas as pl
from jax.experimental.pallas import tpu as pltpu

LANES = 128
SUBLANES = 8
STRIP_ROWS = 128      # rows per fused load+math+reduce strip (16 vregs/operand)
NUM_ACC = 4           # independent (8,128) accumulators


def _ipow(x, e):
    """x ** e for integer e >= 1 via binary exponentiation (pure VPU muls)."""
    result = None
    base = x
    while e:
        if e & 1:
            result = base if result is None else result * base
        e >>= 1
        if e:
            base = base * base
    return result


def _pow_static(d, gamma):
    """d ** gamma for a compile-time gamma, avoiding EUP where possible."""
    g = float(gamma)
    if g == 1.0:
        return d
    if g == 2.0:
        return d * d                                  # module default
    two_g = 2.0 * g
    if two_g == int(two_g) and 1.0 <= two_g <= 32.0:
        e2 = int(two_g)
        if e2 % 2 == 0:
            return _ipow(d, e2 // 2)                  # integer gamma
        return _ipow(jnp.sqrt(d), e2)                 # half-integer gamma
    return jnp.exp(jnp.float32(g) * jnp.log(d))       # general gamma (EUP)


def _l0_block_kernel(pred_ref, target_ref, out_ref, *, gamma, eps, tm):
    """Reduce one (tm, 128) tile of (|p - t| + eps)**gamma to an (8, 128) partial."""

    def strip_sum(row0, nrows):
        # Fused: load strip -> elementwise -> reduce to one (8, 128) vreg.
        p = pred_ref[pl.ds(row0, nrows), :].astype(jnp.float32)
        t = target_ref[pl.ds(row0, nrows), :].astype(jnp.float32)
        d = jnp.abs(p - t) + jnp.float32(eps)
        v = _pow_static(d, gamma)
        # (nrows, 128) -> (nrows//8, 8, 128): tile-aligned relabel; sum over
        # the leading dim is a pile of independent vreg adds (pure VPU).
        return jnp.sum(v.reshape(nrows // SUBLANES, SUBLANES, LANES), axis=0)

    # Static strip schedule (all Python ints -> zero-cost ref views).
    n_full = tm // STRIP_ROWS
    rem = tm % STRIP_ROWS                      # multiple of 8 (tm is)
    strips = [(j * STRIP_ROWS, STRIP_ROWS) for j in range(n_full)]
    if rem:
        strips.append((n_full * STRIP_ROWS, rem))

    # Rotating accumulators keep the add chains short and independent.
    accs = [None] * NUM_ACC
    for k, (row0, nrows) in enumerate(strips):
        part = strip_sum(row0, nrows)
        a = k % NUM_ACC
        accs[a] = part if accs[a] is None else accs[a] + part

    live = [a for a in accs if a is not None]
    while len(live) > 1:                       # pairwise tree combine
        live = [live[i] + live[i + 1] if i + 1 < len(live) else live[i]
                for i in range(0, len(live), 2)]

    out_ref[...] = live[0][None, :, :]         # (1, 8, 128) lane-dense block


def l0_loss(pred, target, gamma=2.0, eps=1e-8, *, tm_max=4096):
    """mean((|pred - target| + eps) ** gamma) via a tiled Pallas TPU kernel."""
    assert pred.shape == target.shape, (pred.shape, target.shape)
    gamma = float(gamma)
    eps = float(eps)

    pf = pred.reshape(-1)
    tf = target.reshape(-1)
    n = pf.shape[0]

    # Pick the row-block size: multiple of 8, capped by tm_max, and shrunk so
    # medium inputs still produce >= 2 blocks (both TCs busy on v7x).
    rows_total = n // LANES
    tm = (min(int(tm_max), rows_total) // SUBLANES) * SUBLANES
    if tm > 0 and rows_total >= 2 * SUBLANES and rows_total // tm < 2:
        tm = ((rows_total // 2) // SUBLANES) * SUBLANES
    num_blocks = rows_total // tm if tm > 0 else 0
    bulk = num_blocks * tm * LANES             # elements handled by the kernel

    total = jnp.float32(0.0)

    if num_blocks > 0:
        # Contiguous prefix slice + reshape: no padded HBM copy.
        p2 = pf[:bulk].reshape(num_blocks * tm, LANES)
        t2 = tf[:bulk].reshape(num_blocks * tm, LANES)

        kernel = functools.partial(_l0_block_kernel,
                                   gamma=gamma, eps=eps, tm=tm)

        partials = pl.pallas_call(
            kernel,
            out_shape=jax.ShapeDtypeStruct((num_blocks, SUBLANES, LANES),
                                           jnp.float32),
            grid=(num_blocks,),
            in_specs=[
                pl.BlockSpec((tm, LANES), lambda i: (i, 0)),
                pl.BlockSpec((tm, LANES), lambda i: (i, 0)),
            ],
            out_specs=pl.BlockSpec((1, SUBLANES, LANES), lambda i: (i, 0, 0)),
            compiler_params=pltpu.CompilerParams(
                dimension_semantics=("parallel",)),
        )(p2, t2)

        total = total + jnp.sum(partials, dtype=jnp.float32)

    if bulk < n:
        # Ragged tail (< tm*128 + 128 elements): one fused elementwise+reduce
        # in plain JAX, no masking or padding required.
        pt = pf[bulk:].astype(jnp.float32)
        tt = tf[bulk:].astype(jnp.float32)
        dt = jnp.abs(pt - tt) + jnp.float32(eps)
        total = total + jnp.sum(_pow_static(dt, gamma), dtype=jnp.float32)

    return total / jnp.float32(n)


def l0_loss_ref(pred, target, gamma=2.0, eps=1e-8):
    """Pure-JAX reference mirroring the PyTorch forward."""
    d = jnp.abs(pred.astype(jnp.float32) - target.astype(jnp.float32))
    return jnp.mean((d + jnp.float32(eps)) ** jnp.float32(gamma))


if __name__ == "__main__":
    key = jax.random.PRNGKey(0)
    kp, kt = jax.random.split(key)

    # Image-restoration-style shape consistent with the module: (B, C, H, W).
    shape = (2, 4, 16, 16)
    pred = jax.random.normal(kp, shape, dtype=jnp.float32)
    target = pred + 0.1 * jax.random.normal(kt, shape, dtype=jnp.float32)

    # Default module params: gamma=2, eps=1e-8 (pure-VPU path, 2 blocks).
    loss = jax.block_until_ready(l0_loss(pred, target))
    ref = l0_loss_ref(pred, target)
    assert jnp.allclose(loss, ref, rtol=1e-5, atol=1e-6), (loss, ref)

    # Non-default gamma exercises the half-integer sqrt path.
    loss15 = jax.block_until_ready(l0_loss(pred, target, gamma=1.5))
    ref15 = l0_loss_ref(pred, target, gamma=1.5)
    assert jnp.allclose(loss15, ref15, rtol=1e-4, atol=1e-6), (loss15, ref15)

    # Arbitrary gamma exercises the exp/log (EUP) fallback.
    loss_g = jax.block_until_ready(l0_loss(pred, target, gamma=1.7))
    ref_g = l0_loss_ref(pred, target, gamma=1.7)
    assert jnp.allclose(loss_g, ref_g, rtol=1e-4, atol=1e-6), (loss_g, ref_g)

    # Tiny non-128-multiple shape: handled entirely by the fused JAX tail.
    shape2 = (2, 3, 5, 7)
    p2 = jax.random.normal(kp, shape2, dtype=jnp.float32)
    t2 = jax.random.normal(kt, shape2, dtype=jnp.float32)
    loss2 = jax.block_until_ready(l0_loss(p2, t2))
    ref2 = l0_loss_ref(p2, t2)
    assert jnp.allclose(loss2, ref2, rtol=1e-5, atol=1e-6), (loss2, ref2)

    # Shape with an aligned bulk + ragged tail (kernel + tail path together).
    shape3 = (4, 4, 30, 17)
    p3 = jax.random.normal(kp, shape3, dtype=jnp.float32)
    t3 = jax.random.normal(kt, shape3, dtype=jnp.float32)
    loss3 = jax.block_until_ready(l0_loss(p3, t3))
    ref3 = l0_loss_ref(p3, t3)
    assert jnp.allclose(loss3, ref3, rtol=1e-5, atol=1e-6), (loss3, ref3)

    # Larger shape exercises the multi-strip in-kernel accumulation.
    shape4 = (8, 8, 64, 64)
    p4 = jax.random.normal(kp, shape4, dtype=jnp.float32)
    t4 = p4 + 0.05 * jax.random.normal(kt, shape4, dtype=jnp.float32)
    loss4 = jax.block_until_ready(l0_loss(p4, t4))
    ref4 = l0_loss_ref(p4, t4)
    assert jnp.allclose(loss4, ref4, rtol=1e-5, atol=1e-6), (loss4, ref4)

    print("KERNEL_OK")
</pallas_src>

<mosaic_0001>
module attributes {stable_mosaic.version = 11 : i64} {
  func.func @_l0_block_kernel(%arg0: i32, %arg1: memref<8x128xf32, #tpu.memory_space<vmem>>, %arg2: memref<8x128xf32, #tpu.memory_space<vmem>>, %arg3: memref<1x8x128xf32, #tpu.memory_space<vmem>>) attributes {dimension_semantics = [#tpu.dimension_semantics<parallel>], iteration_bounds = array<i64: 2>, scalar_prefetch = 0 : i64, scratch_operands = 0 : i64, tpu.core_type = #tpu.core_type<tc>, window_params = [{transform_indices = @transform_0, window_bounds = array<i64: 8, 128>}, {transform_indices = @transform_1, window_bounds = array<i64: 8, 128>}, {transform_indices = @transform_2, window_bounds = array<i64: 1, 8, 128>}]} {
    %c0 = arith.constant 0 : index
    %c0_0 = arith.constant 0 : index
    %0 = vector.load %arg1[%c0, %c0_0] : memref<8x128xf32, #tpu.memory_space<vmem>>, vector<8x128xf32>
    %c0_1 = arith.constant 0 : index
    %c0_2 = arith.constant 0 : index
    %1 = vector.load %arg2[%c0_1, %c0_2] : memref<8x128xf32, #tpu.memory_space<vmem>>, vector<8x128xf32>
    %2 = arith.subf %0, %1 : vector<8x128xf32>
    %3 = math.absf %2 : vector<8x128xf32>
    %cst = arith.constant 9.99999993E-9 : f32
    %4 = vector.broadcast %cst : f32 to vector<8x128xf32>
    %5 = arith.addf %3, %4 : vector<8x128xf32>
    %6 = arith.mulf %5, %5 : vector<8x128xf32>
    %7 = vector.shape_cast %6 : vector<8x128xf32> to vector<1x8x128xf32>
    %cst_3 = arith.constant dense<0.000000e+00> : vector<8x128xf32>
    %8 = vector.multi_reduction <add>, %7, %cst_3 [0] : vector<1x8x128xf32> to vector<8x128xf32>
    %9 = vector.shape_cast %8 : vector<8x128xf32> to vector<1x8x128xf32>
    %c0_4 = arith.constant 0 : index
    %c0_5 = arith.constant 0 : index
    %c0_6 = arith.constant 0 : index
    %10 = vector.load %arg3[%c0_4, %c0_5, %c0_6] : memref<1x8x128xf32, #tpu.memory_space<vmem>>, vector<1x8x128xf32>
    tpu.vector_store %arg3[%c0_4, %c0_5, %c0_6], %9 {strides = array<i32>} : memref<1x8x128xf32, #tpu.memory_space<vmem>>, vector<1x8x128xf32>,
    return
  }
  func.func @transform_0(%arg0: i32) -> (i32, i32) {
    %c0_i32 = arith.constant 0 : i32
    %c0_i32_0 = arith.constant 0 : i32
    return %arg0, %c0_i32 : i32, i32
  }
  func.func @transform_1(%arg0: i32) -> (i32, i32) {
    %c0_i32 = arith.constant 0 : i32
    %c0_i32_0 = arith.constant 0 : i32
    return %arg0, %c0_i32 : i32, i32
  }
  func.func @transform_2(%arg0: i32) -> (i32, i32, i32) {
    %c0_i32 = arith.constant 0 : i32
    %c0_i32_0 = arith.constant 0 : i32
    %c0_i32_1 = arith.constant 0 : i32
    return %arg0, %c0_i32, %c0_i32_0 : i32, i32, i32
  }
}

</mosaic_0001>

<bundles_post_ra>
// kernel: tpu_custom_call.1
= control target key start
LH: loop header
LB: loop body
LE: loop exit
PB: predicated region body
PF: predicated region fallthrough
CT: control target
= control target key end

     0   :  { %7 = vsyncpa [#allocation3], 0  ;;  %s690_s0 = inlined_call_operand.hbm [shape: f32[16,128], index: 0, kind: input, shape index: {}]   ;;  %s691_s1 = inlined_call_operand.hbm [shape: f32[16,128], index: 1, kind: input, shape index: {}]   ;;  %s692_s2 = inlined_call_operand.hbm [shape: f32[2,8,128], index: 2, kind: output, shape index: {}]  }
   0x1   :  { %9 = vsyncpa [#allocation3 + $0x1], 0 }
   0x2   :  { %10 = vsyncpa [#allocation6], 0 }
   0x3   :  { %12 = vsyncpa [#allocation6 + $0x1], 0 }
   0x4   :  { %13 = vsyncpa [#allocation4], 0 }
   0x5   :  { %15 = vsyncpa [#allocation4 + $0x1], 0  ;;  %s530_s9 = smov 0   ;;  %s532_s10 = smov 0  }
   0x6   :  { %s534_s11 = smov 0   ;;  %s536_s12 = smov 0  }
   0x7 LB: > { %s551_s13 = sadd.s32 4294967295, %s513_s12   ;;  %s317_s14 = sadd.s32 4294967294, %s513_s12   ;;  %s513_s12 = sphi %s536_s12, %s703_s12   ;;  %s509_s11 = sphi %s534_s11, %s702_s11   ;;  %s505_s10 = sphi %s532_s10, %s701_s10   ;;  %s501_s9 = sphi %s530_s9, %s700_s9  }
   0x8   : > { %s555_s15 = sadd.s32 1, %s513_s12   ;;  %s28_s16 = sadd.s32 1, %s509_s11 }
   0x9   : > { %s25_s17 = ssub.s32 %s513_s12, %s555_s15  ;;  %p35_p0 = scmp.ne.s32.totalorder %s509_s11, %s505_s10 }
   0xa   : > { %p26_p1 = scmp.eq.s32.totalorder %s25_s17, 0  ;;  %p36_p2 = scmp.eq.s32.totalorder %s513_s12, 0 }
   0xb   : > { %p41_p3 = scmp.ne.s32.totalorder %s505_s10, %s501_s9  ;;  %p42_p4 = scmp.eq.s32.totalorder %s551_s13, 0 }
   0xc   : > { %s567_s18 = scalar_select %p26_p1, %s509_s11, %s28_s16  }
   0xd   : > { %p569_p5 = por %p36_p2, %p35_p0  ;;  %p573_p6 = por %p42_p4, %p41_p3 }
   0xe   : > { %p91_p7 = scmp.eq.s32.totalorder %s551_s13, 1  ;;  %p97_p8 = scmp.eq.s32.totalorder %s317_s14, 1 }
   0xf   : > { %p349_p10 = scmp.lt.s32.totalorder %s513_s12, 2  ;;  %s589_s23 = sand.u32 1, %s509_s11  }
  0x10   : > { %p580_p11 = por %p91_p7, %p35_p0  ;;  %p584_p12 = por %p97_p8, %p41_p3 }
  0x11   : > { %s321_s24 = sshll.u32 %s513_s12, 3  ;;  %s320_s25 = sshll.u32 %s589_s23, 3 }
  0x12   : > { %s125_s28 = scalar_lea.hbm %s690_s0, %s321_s24  ;;  %s121_s30 = scalar_lea.vmem [#allocation2], %s320_s25 }
  0x13   : > { %s127_s29 = sshll.u32 %s125_s28, 4  ;;  %s129_s3 = sshll.u32 %s121_s30, 4  ;;  %s128_s29 = int_to_ptr.hbm [resolvable:$true] %s127_s29  ;;  %s130_s3 = int_to_ptr.vmem [resolvable:$true] %s129_s3 }
  0x14   : > { %p598_p13 = pnand %p349_p10, %p569_p5  ;;  %p324_p0 = scmp.ge.s32.totalorder %s513_s12, 1 }
  0x15   : > { %p153_p1 = scmp.lt.s32.totalorder %s513_s12, 3  ;;  %s118_s5 = scalar_lea.sflag [#allocation3], %s589_s23 }
  0x16   : > { %s383_s6 = sshra.s32 %s128_s29, 4  ;;  %p387_p3 = pneg %p598_p13  ;;  %s384_s6 = int_to_ptr.hbm [resolvable:$true] %s383_s6 }
  0x17   : > { %s385_s7 = scalar_lea.hbm %s384_s6, 8  ;;  %s390_s16 = scalar_lea.hbm %s690_s0, 16 }
  0x18   : > { %p386_p2 = scmp.ne.s32.totalorder %s384_s6, %s385_s7  ;;  %p391_p5 = scmp.lt.s32.totalorder %s384_s6, %s690_s0 }
  0x19   : > { %p392_p8 = scmp.lt.s32.totalorder %s390_s16, %s385_s7 }
  0x1a   : > { %p388_p4 = pnand %p387_p3, %p386_p2 }
  0x1b   : > { %p393_p10 = por %p392_p8, %p391_p5 }
  0x1c   : > { %p389_p7 = pneg %p388_p4 }
  0x1e   : > { %p394_p9 = pnand %p393_p10, %p389_p7 }
  0x20   : > { %397 = shalt.err (!%p394_p9)
}
  0x21   : > { %341 = dma.hbm_to_vmem [thread:$0]  (!%p598_p13), %s128_s29, 128, %s130_s3, %s118_s5  }
  0x22   : > { %p622_p2 = pnand %p324_p0, %p153_p1  ;;  %s144_s30 = scalar_lea.hbm %s691_s1, %s321_s24 }
  0x23   : > { %s146_s6 = sshll.u32 %s144_s30, 4  ;;  %s140_s7 = scalar_lea.vmem [#allocation5], %s320_s25  ;;  %s147_s6 = int_to_ptr.hbm [resolvable:$true] %s146_s6 }
  0x24   : > { %s148_s8 = sshll.u32 %s140_s7, 4  ;;  %s137_s14 = scalar_lea.sflag [#allocation6], %s589_s23  ;;  %s149_s8 = int_to_ptr.vmem [resolvable:$true] %s148_s8 }
  0x25   : > { %s413_s16 = sshra.s32 %s147_s6, 4  ;;  %s420_s5 = scalar_lea.hbm %s691_s1, 16  ;;  %s414_s16 = int_to_ptr.hbm [resolvable:$true] %s413_s16 }
  0x26   : > { %s415_s17 = scalar_lea.hbm %s414_s16, 8  ;;  %p421_p4 = scmp.lt.s32.totalorder %s414_s16, %s691_s1 }
  0x27   : > { %p416_p9 = scmp.ne.s32.totalorder %s414_s16, %s415_s17  ;;  %p422_p7 = scmp.lt.s32.totalorder %s420_s5, %s415_s17 }
  0x29   : > { %p418_p0 = pnand %p416_p9, %p387_p3  ;;  %p423_p5 = por %p422_p7, %p421_p4 }
  0x2b   : > { %p419_p1 = pneg %p418_p0 }
  0x2d   : > { %p424_p8 = pnand %p423_p5, %p419_p1 }
  0x2f   : > { %427 = shalt.err (!%p424_p8)
}
  0x30   : > { %344 = dma.hbm_to_vmem [thread:$0]  (!%p598_p13), %s147_s6, 128, %s149_s8, %s137_s14  }
  0x31   : > { %157 = sbr.rel (%p622_p2) target bundleno = 72 (0x48), region = 28  ;;  %s644_s23 = sand.u32 (!%p622_p2), 1, %s505_s10  }
  0x32   : > { %s325_s25 = sshll.u32 (!%p622_p2), %s644_s23, 3  ;;  %s160_s27 = scalar_lea.sflag (!%p622_p2), [#allocation3], %s644_s23 }
  0x33   : > { %s163_s28 = scalar_lea.vmem (!%p622_p2), [#allocation2], %s325_s25 }
  0x36   : > { %488 = dma.done.wait (%p573_p6), %s160_s27, 128  }
  0x37   : > { %490 = vsyncadd (%p573_p6), %s160_s27, 4294967168  ;;  %s170_s4 = scalar_lea.sflag [#allocation6], %s644_s23  ;;  %s173_s30 = scalar_lea.vmem [#allocation5], %s325_s25 }
  0x38   : > { %492 = dma.done.wait (%p573_p6), %s170_s4, 128  }
  0x39   : > { %494 = vsyncadd (%p573_p6), %s170_s4, 4294967168  ;;  %s329_s26 = sshll.u32 %s551_s13, 3  ;;  %v200_v0 = vld [vmem:[%s163_s28] sm:$0xff]  ;;  %v201_v1 = vld [vmem:[%s173_s30] sm:$0xff]  ;;  %s199_s14 = scalar_lea.vmem [#allocation7], %s325_s25 }
  0x3a   : > { %v202_v2 = vsub.f32 %v200_v0, %v201_v1  ;;  %s219_s8 = scalar_lea.hbm %s692_s2, %s329_s26  ;;  %s221_s16 = sshll.u32 %s199_s14, 4  ;;  %s222_s16 = int_to_ptr.vmem [resolvable:$true] %s221_s16 }
  0x3b   : > { %s223_s17 = sshll.u32 %s219_s8, 4  ;;  %s209_s20 = scalar_lea.sflag [#allocation4], %s644_s23  ;;  %s224_s17 = int_to_ptr.hbm [resolvable:$true] %s223_s17 }
  0x3c   : > { %v203_v3 = vand.u32 2147483647, %v202_v2  ;;  %s457_s29 = sshra.s32 %s224_s17, 4  ;;  %s463_s19 = scalar_lea.hbm %s692_s2, 16  ;;  %s458_s29 = int_to_ptr.hbm [resolvable:$true] %s457_s29 }
  0x3d   : > { %s459_s13 = scalar_lea.hbm %s458_s29, 8  ;;  %p464_p10 = scmp.lt.s32.totalorder %s458_s29, %s692_s2 }
  0x3e   : > { %v204_v4 = vadd.f32 1e-08, %v203_v3  ;;  %p460_p6 = scmp.ne.s32.totalorder %s458_s29, %s459_s13  ;;  %p465_p2 = scmp.lt.s32.totalorder %s463_s19, %s459_s13 }
  0x40   : > { %v205_v5 = vmul.f32 %v204_v4, %v204_v4  ;;  %p461_p13 = pnand %p460_p6, %p580_p11  ;;  %p466_p9 = por %p465_p2, %p464_p10 }
  0x42   : > { %207 = vst [vmem:[%s199_s14] sm:$0xff] %v205_v5  ;;  %p462_p3 = pneg %p461_p13 }
  0x44   : > { %p467_p0 = pnand %p466_p9, %p462_p3 }
  0x46   : > { %470 = shalt.err (!%p467_p0)
}
  0x47   : > { %336 = dma.vmem_to_hbm [thread:$0]  (%p580_p11), %s222_s16, 128, %s224_s17, %s209_s20  }
  0x48 PF: > { %s235_s23 = sand.u32 1, %s501_s9   ;;  %p699_p1 = scmp.ge.s32.totalorder %s513_s12, 2 }
  0x49   : > { %s236_s27 = scalar_lea.sflag [#allocation4], %s235_s23 }
  0x4a   : > { %p346_p4 = pnand %p699_p1, %p584_p12 }
  0x4c   : > { %p347_p7 = pneg %p346_p4 }
  0x4e   : > { %496 = dma.done.wait (%p347_p7), %s236_s27, 128  }
  0x4f   : > { %498 = vsyncadd (%p347_p7), %s236_s27, 4294967168  ;;  %p18_p5 = scmp.ge.s32.totalorder %s555_s15, 4   ;;  %s700_s9 = smov %s505_s10 }
  0x50   : > { %s701_s10 = smov %s509_s11  ;;  %s702_s11 = smov %s567_s18 }
  0x51   : > { %s703_s12 = smov %s555_s15  ;;  %20 = sbr.rel (!%p18_p5) target bundleno = 7 (0x7), region = 86 }
  0x56   :  { %242 = vsyncpa [#allocation3], 1 }
  0x57   :  { %244 = vsyncpa [#allocation3 + $0x1], 1 }
  0x58   :  { %245 = vsyncpa [#allocation6], 1 }
  0x59   :  { %247 = vsyncpa [#allocation6 + $0x1], 1 }
  0x5a   :  { %248 = vsyncpa [#allocation4], 1 }
  0x5b   :  { %250 = vsyncpa [#allocation4 + $0x1], 1 }

</bundles_post_ra>
